<compile_context>
chip_gen: v5e
topology: v5e:2x2
jax: 0.10.0
libtpu: 0.0.40
codegen_flags: <defaults>
</compile_context>

<pallas_src>
import math

import jax
import jax.numpy as jnp
from jax.experimental import pallas as pl
from jax.experimental.pallas import tpu as pltpu


def _round_up(n, m):
    return ((n + m - 1) // m) * m


def _choose_batch_tiling(B, target_tile, min_tiles=1):
    """Pick (TB, B_pad, n_tiles): TB a multiple of 128, equal-sized tiles, minimal padding."""
    lanes = _round_up(max(B, 1), 128) // 128            # batch extent in 128-lane units
    target_lanes = max(1, min(target_tile // 128, lanes))
    n_tiles = max(int(min_tiles), math.ceil(lanes / target_lanes))
    tb_lanes = math.ceil(lanes / n_tiles)
    TB = tb_lanes * 128
    B_pad = TB * n_tiles
    return TB, B_pad, n_tiles


# ----------------------------- Pallas kernel -----------------------------

def _make_kernel(n_first, n_blocks, n_res, xo, out_pad, compute_dtype, tanh_in_compute_dtype):
    """Kernel specialized to static layer counts / sizes.

    Ref layout:
      x_ref   : VMEM (P, TB)  compute_dtype   -- padded, transposed input tile
      w_ref   : VMEM (L, P, P) compute_dtype  -- packed transposed weights (out, in), zero padded
      b_ref   : VMEM (L, P, 1) f32            -- packed biases (|alpha| folded into block last layers)
      out_ref : VMEM (out_pad, TB) f32
      xa_ref  : VMEM scratch (P, TB) compute_dtype -- persistent [x | out] contraction buffer
    """
    f32 = jnp.float32

    def kernel(x_ref, w_ref, b_ref, out_ref, xa_ref):

        def dense(li, h, activate, rows=None):
            if rows is None:
                W = w_ref[li]                              # (P, P) compute_dtype
                b = b_ref[li]                              # (P, 1) f32
            else:                                          # final layers: only out_pad rows matter
                W = w_ref[li, :rows, :]                    # (rows, P)
                b = b_ref[li, :rows, :]                    # (rows, 1)
            y = jnp.dot(W, h, preferred_element_type=f32) + b
            if activate:
                if tanh_in_compute_dtype:                  # bf16 EUP (v6e/v7x); result feeds bf16 MXU
                    return jnp.tanh(y.astype(compute_dtype))
                return jnp.tanh(y).astype(compute_dtype)   # f32 EUP (v5e-safe)
            return y                                       # f32 (rows, TB)

        x = x_ref[...]                                     # (P, TB) compute_dtype, zero padded
        xa_ref[...] = x                                    # init [x | out] buffer (out rows = 0)

        # ---- first MLP: insize -> h_sf_sizes -> outsize ----
        h = x
        for li in range(n_first):
            last = li == n_first - 1
            h = dense(li, h, activate=not last, rows=out_pad if last else None)
        out = h                                            # f32 (out_pad, TB); rows >= outsize are 0

        # ---- stacked residual refinement blocks ----
        base = n_first
        for k in range(n_blocks):
            # Refresh ONLY the sublane-aligned "out" rows of the concat buffer.
            xa_ref[xo:xo + out_pad, :] = out.astype(compute_dtype)
            h = xa_ref[...]                                # single fused operand for layer 0
            for li in range(n_res):
                last = li == n_res - 1
                h = dense(base + k * n_res + li, h, activate=not last,
                          rows=out_pad if last else None)
            out = out + h                                  # |alpha_k| already folded into W/b

        out_ref[...] = out.astype(out_ref.dtype)

    return kernel


# ----------------------------- parameter packing -----------------------------

def _pack_layers(layers, P, compute_dtype):
    """layers: list of (W, b, col_map); W (fan_in, fan_out), b (1, fan_out),
    col_map: list of (src_start, length, dst_col) placing fan_in slices on the padded axis.
    Returns W_pack (L, P, P) compute_dtype (transposed to (out, in)) and b_pack (L, P, 1) f32."""
    Ws, bs = [], []
    for W, b, col_map in layers:
        W = jnp.asarray(W, jnp.float32)
        fo = W.shape[1]
        Wt = jnp.zeros((P, P), jnp.float32)
        for src, length, dst in col_map:
            Wt = Wt.at[:fo, dst:dst + length].set(W[src:src + length, :].T)
        bt = jnp.zeros((P, 1), jnp.float32).at[:fo, 0].set(
            jnp.asarray(b, jnp.float32).reshape(-1))
        Ws.append(Wt)
        bs.append(bt)
    return jnp.stack(Ws).astype(compute_dtype), jnp.stack(bs)


# ----------------------------- parameter init -----------------------------

def init_params(key, insize, outsize, h_sf_sizes, h_res_sizes, n_blocks, alpha_init=0.1):
    """Deterministic init mimicking nn.Linear's U(-1/sqrt(fan_in), 1/sqrt(fan_in))."""

    def linear(k, fan_in, fan_out):
        kw, kb = jax.random.split(k)
        lim = 1.0 / jnp.sqrt(jnp.float32(fan_in))
        W = jax.random.uniform(kw, (fan_in, fan_out), jnp.float32, -lim, lim)
        b = jax.random.uniform(kb, (1, fan_out), jnp.float32, -lim, lim)
        return W, b

    def mlp_params(k, sizes):
        ks = jax.random.split(k, len(sizes) - 1)
        return [linear(ks[j], sizes[j], sizes[j + 1]) for j in range(len(sizes) - 1)]

    key_first, key_blocks = jax.random.split(key)
    first_sizes = [insize] + list(h_sf_sizes) + [outsize]
    res_sizes = [insize + outsize] + list(h_res_sizes) + [outsize]

    return {
        "first": mlp_params(key_first, first_sizes),
        "blocks": [mlp_params(bk, res_sizes)
                   for bk in jax.random.split(key_blocks, n_blocks)] if n_blocks > 0 else [],
        "alpha": jnp.full((1, max(n_blocks, 1)), alpha_init, dtype=jnp.float32),
    }


# ----------------------------- wrapper -----------------------------

def stacked_res_forward(x, params, i=None, compute_dtype=jnp.float32,
                        batch_tile=4096, min_tiles=1, bf16_tanh=True):
    """StackedRes forward.

    batch_tile : target batch tile (lanes); sweep 2048-8192 for large batches.
    min_tiles  : set to 2 on v7x so both TensorCores get an equal batch tile.
    bf16_tanh  : when compute_dtype is bf16, run tanh on the bf16 EUP (v6e/v7x). f32 path unaffected.
    """
    first = params["first"]
    blocks_all = params["blocks"]
    alpha = jnp.asarray(params["alpha"], jnp.float32).reshape(-1)

    insize = first[0][0].shape[0]
    outsize = first[-1][0].shape[1]
    n_total = len(blocks_all)

    if i is None:
        i = n_total
    i = int(min(i, n_total))
    blocks = blocks_all[:i]
    n_res = len(blocks_all[0]) if blocks_all else 1

    is_bf16 = jnp.dtype(compute_dtype) == jnp.dtype(jnp.bfloat16)
    tanh_in_cd = bool(bf16_tanh and is_bf16)
    align = 16 if is_bf16 else 8                      # packed-sublane alignment for compute dtype

    # Sublane-aligned placement of the [x | out] concat buffer.
    xo = _round_up(insize, align)                     # start row of the "out" segment
    out_pad = _round_up(outsize, align)               # carried residual rows
    concat_in = xo + out_pad

    # Common feature pad P over every fan_in / fan_out (and the padded concat width).
    dims = [insize, outsize, concat_in]
    for W, _ in list(first) + [l for blk in blocks_all for l in blk]:
        dims += [W.shape[0], W.shape[1]]
    P = _round_up(max(dims), align)

    # Pack every linear layer (first MLP + selected blocks) into two contiguous arrays.
    # Block layer-0 columns are shifted so the "out" part lands at the aligned offset xo,
    # and |alpha_k| is folded into each block's last-layer W/b (no in-kernel multiply).
    layers = [(W, b, [(0, W.shape[0], 0)]) for (W, b) in first]
    for k, blk in enumerate(blocks):
        a_k = jnp.abs(alpha[k])
        for li, (W, b) in enumerate(blk):
            cmap = ([(0, insize, 0), (insize, outsize, xo)] if li == 0
                    else [(0, W.shape[0], 0)])
            if li == len(blk) - 1:
                W = jnp.asarray(W, jnp.float32) * a_k
                b = jnp.asarray(b, jnp.float32) * a_k
            layers.append((W, b, cmap))
    W_pack, b_pack = _pack_layers(layers, P, compute_dtype)
    n_layers = len(layers)

    # Batch tiling: batch on the lane axis; equal 128-multiple tiles, minimal padding.
    B = x.shape[0]
    TB, B_pad, n_tiles = _choose_batch_tiling(B, batch_tile, min_tiles=min_tiles)

    # One-pass pad + transpose + cast directly into compute dtype.
    x_t = (jnp.zeros((P, B_pad), compute_dtype)
           .at[:insize, :B].set(jnp.asarray(x).T.astype(compute_dtype)))

    kernel = _make_kernel(len(first), i, n_res, xo, out_pad, compute_dtype, tanh_in_cd)

    out_t = pl.pallas_call(
        kernel,
        out_shape=jax.ShapeDtypeStruct((out_pad, B_pad), jnp.float32),
        grid_spec=pltpu.PrefetchScalarGridSpec(
            num_scalar_prefetch=0,
            grid=(n_tiles,),
            in_specs=[
                pl.BlockSpec((P, TB), lambda b: (0, b)),                  # x tile (streams)
                pl.BlockSpec((n_layers, P, P), lambda b: (0, 0, 0)),      # packed W (resident)
                pl.BlockSpec((n_layers, P, 1), lambda b: (0, 0, 0)),      # packed b (resident)
            ],
            out_specs=pl.BlockSpec((out_pad, TB), lambda b: (0, b)),
            scratch_shapes=[pltpu.VMEM((P, TB), compute_dtype)],          # [x | out] buffer
        ),
        compiler_params=pltpu.CompilerParams(
            dimension_semantics=("parallel",)),
    )(x_t, W_pack, b_pack)

    return out_t[:outsize, :B].T


# ----------------------------- pure-JAX reference -----------------------------

def stacked_res_reference(x, params, i=None):
    def mlp(inp, layers):
        h = inp
        for li, (W, b) in enumerate(layers):
            h = h @ W + b
            if li < len(layers) - 1:
                h = jnp.tanh(h)
        return h

    out = mlp(x, params["first"])
    blocks = params["blocks"] if i is None else params["blocks"][:i]
    for k, blk in enumerate(blocks):
        xi = jnp.concatenate([x, out], axis=-1)
        out = out + jnp.abs(params["alpha"][0, k]) * mlp(xi, blk)
    return out


# ----------------------------- main -----------------------------

if __name__ == "__main__":
    insize, outsize = 16, 8
    h_sf_sizes = [32, 32]
    h_res_sizes = [32, 32]
    n_stacked = 3
    batch = 8

    key = jax.random.PRNGKey(0)
    key_x, key_p, key_xl = jax.random.split(key, 3)
    x = jax.random.normal(key_x, (batch, insize), dtype=jnp.float32)
    params = init_params(key_p, insize, outsize, h_sf_sizes, h_res_sizes,
                         n_stacked, alpha_init=0.1)

    # full forward (i = n_stacked), f32 path
    y = jax.block_until_ready(stacked_res_forward(x, params))
    y_ref = stacked_res_reference(x, params)
    assert y.shape == (batch, outsize)
    assert jnp.allclose(y, y_ref, atol=1e-4, rtol=1e-4), (
        f"mismatch: max abs err {jnp.max(jnp.abs(y - y_ref))}")

    # partial forward (first 2 blocks), like model(x, i=2)
    y2 = jax.block_until_ready(stacked_res_forward(x, params, i=2))
    y2_ref = stacked_res_reference(x, params, i=2)
    assert jnp.allclose(y2, y2_ref, atol=1e-4, rtol=1e-4), (
        f"mismatch (i=2): max abs err {jnp.max(jnp.abs(y2 - y2_ref))}")

    # v7x-style even 2-way tile split (both TensorCores get an equal tile)
    ysplit = jax.block_until_ready(stacked_res_forward(x, params, min_tiles=2))
    assert jnp.allclose(ysplit, y_ref, atol=1e-4, rtol=1e-4), (
        f"mismatch (min_tiles=2): max abs err {jnp.max(jnp.abs(ysplit - y_ref))}")

    # larger batch: now a single 640-lane tile (minimal padding)
    x_large = jax.random.normal(key_xl, (600, insize), dtype=jnp.float32)
    yl = jax.block_until_ready(stacked_res_forward(x_large, params))
    yl_ref = stacked_res_reference(x_large, params)
    assert jnp.allclose(yl, yl_ref, atol=1e-4, rtol=1e-4), (
        f"mismatch (large batch): max abs err {jnp.max(jnp.abs(yl - yl_ref))}")

    # multi-tile grid + ragged last tile coverage
    yl3 = jax.block_until_ready(stacked_res_forward(x_large, params, batch_tile=256))
    assert jnp.allclose(yl3, yl_ref, atol=1e-4, rtol=1e-4), (
        f"mismatch (multi-tile): max abs err {jnp.max(jnp.abs(yl3 - yl_ref))}")

    # bf16 operand + bf16-tanh path (v6e/v7x MXU/EUP-native; accumulation/residual stay f32)
    yb = jax.block_until_ready(
        stacked_res_forward(x, params, compute_dtype=jnp.bfloat16))
    assert jnp.allclose(yb, y_ref, atol=5e-2, rtol=5e-2), (
        f"bf16 mismatch: max abs err {jnp.max(jnp.abs(yb - y_ref))}")

    print("KERNEL_OK")
</pallas_src>

<mosaic_0001>
module attributes {stable_mosaic.version = 11 : i64} {
  func.func @kernel(%arg0: i32, %arg1: memref<32x128xf32, #tpu.memory_space<vmem>>, %arg2: memref<12x32x32xf32, #tpu.memory_space<vmem>>, %arg3: memref<12x32x1xf32, #tpu.memory_space<vmem>>, %arg4: memref<8x128xf32, #tpu.memory_space<vmem>>, %arg5: memref<32x128xf32, #tpu.memory_space<vmem>>) attributes {dimension_semantics = [#tpu.dimension_semantics<parallel>], iteration_bounds = array<i64: 1>, scalar_prefetch = 0 : i64, scratch_operands = 1 : i64, tpu.core_type = #tpu.core_type<tc>, window_params = [{transform_indices = @transform_0, window_bounds = array<i64: 32, 128>}, {pipeline_mode = #tpu.pipeline_mode<synchronous>, transform_indices = @transform_1, window_bounds = array<i64: 12, 32, 32>}, {pipeline_mode = #tpu.pipeline_mode<synchronous>, transform_indices = @transform_2, window_bounds = array<i64: 12, 32, 1>}, {transform_indices = @transform_3, window_bounds = array<i64: 8, 128>}]} {
    %c0 = arith.constant 0 : index
    %c0_0 = arith.constant 0 : index
    %0 = vector.load %arg1[%c0, %c0_0] : memref<32x128xf32, #tpu.memory_space<vmem>>, vector<32x128xf32>
    %c0_1 = arith.constant 0 : index
    %c0_2 = arith.constant 0 : index
    %1 = vector.load %arg5[%c0_1, %c0_2] : memref<32x128xf32, #tpu.memory_space<vmem>>, vector<32x128xf32>
    tpu.vector_store %arg5[%c0_1, %c0_2], %0 {strides = array<i32>} : memref<32x128xf32, #tpu.memory_space<vmem>>, vector<32x128xf32>,
    %c0_3 = arith.constant 0 : index
    %c0_4 = arith.constant 0 : index
    %c0_5 = arith.constant 0 : index
    %2 = vector.load %arg2[%c0_3, %c0_4, %c0_5] : memref<12x32x32xf32, #tpu.memory_space<vmem>>, vector<1x32x32xf32>
    %3 = vector.shape_cast %2 : vector<1x32x32xf32> to vector<32x32xf32>
    %c0_6 = arith.constant 0 : index
    %c0_7 = arith.constant 0 : index
    %c0_8 = arith.constant 0 : index
    %4 = vector.load %arg3[%c0_6, %c0_7, %c0_8] : memref<12x32x1xf32, #tpu.memory_space<vmem>>, vector<1x32x1xf32>
    %5 = vector.shape_cast %4 : vector<1x32x1xf32> to vector<32x1xf32>
    %cst = arith.constant dense<0.000000e+00> : vector<32x128xf32>
    %6 = tpu.matmul %3, %0, %cst {dimension_numbers = #tpu.dot_dimension_numbers<[1], [0], [0], [1], [0, 0, 1, 1], [], []>} : vector<32x32xf32>, vector<32x128xf32>, vector<32x128xf32> -> vector<32x128xf32>
    %7 = vector.broadcast %5 : vector<32x1xf32> to vector<32x128xf32>
    %8 = arith.addf %6, %7 : vector<32x128xf32>
    %9 = math.tanh %8 : vector<32x128xf32>
    %c1 = arith.constant 1 : index
    %c0_9 = arith.constant 0 : index
    %c0_10 = arith.constant 0 : index
    %10 = vector.load %arg2[%c1, %c0_9, %c0_10] : memref<12x32x32xf32, #tpu.memory_space<vmem>>, vector<1x32x32xf32>
    %11 = vector.shape_cast %10 : vector<1x32x32xf32> to vector<32x32xf32>
    %c1_11 = arith.constant 1 : index
    %c0_12 = arith.constant 0 : index
    %c0_13 = arith.constant 0 : index
    %12 = vector.load %arg3[%c1_11, %c0_12, %c0_13] : memref<12x32x1xf32, #tpu.memory_space<vmem>>, vector<1x32x1xf32>
    %13 = vector.shape_cast %12 : vector<1x32x1xf32> to vector<32x1xf32>
    %cst_14 = arith.constant dense<0.000000e+00> : vector<32x128xf32>
    %14 = tpu.matmul %11, %9, %cst_14 {dimension_numbers = #tpu.dot_dimension_numbers<[1], [0], [0], [1], [0, 0, 1, 1], [], []>} : vector<32x32xf32>, vector<32x128xf32>, vector<32x128xf32> -> vector<32x128xf32>
    %15 = vector.broadcast %13 : vector<32x1xf32> to vector<32x128xf32>
    %16 = arith.addf %14, %15 : vector<32x128xf32>
    %17 = math.tanh %16 : vector<32x128xf32>
    %c2 = arith.constant 2 : index
    %c0_15 = arith.constant 0 : index
    %c0_16 = arith.constant 0 : index
    %18 = vector.load %arg2[%c2, %c0_15, %c0_16] : memref<12x32x32xf32, #tpu.memory_space<vmem>>, vector<1x8x32xf32>
    %19 = vector.shape_cast %18 : vector<1x8x32xf32> to vector<8x32xf32>
    %c2_17 = arith.constant 2 : index
    %c0_18 = arith.constant 0 : index
    %c0_19 = arith.constant 0 : index
    %20 = vector.load %arg3[%c2_17, %c0_18, %c0_19] : memref<12x32x1xf32, #tpu.memory_space<vmem>>, vector<1x8x1xf32>
    %21 = vector.shape_cast %20 : vector<1x8x1xf32> to vector<8x1xf32>
    %cst_20 = arith.constant dense<0.000000e+00> : vector<8x128xf32>
    %22 = tpu.matmul %19, %17, %cst_20 {dimension_numbers = #tpu.dot_dimension_numbers<[1], [0], [0], [1], [0, 0, 1, 1], [], []>} : vector<8x32xf32>, vector<32x128xf32>, vector<8x128xf32> -> vector<8x128xf32>
    %23 = vector.broadcast %21 : vector<8x1xf32> to vector<8x128xf32>
    %24 = arith.addf %22, %23 : vector<8x128xf32>
    %c16 = arith.constant 16 : index
    %c0_21 = arith.constant 0 : index
    %25 = vector.load %arg5[%c16, %c0_21] : memref<32x128xf32, #tpu.memory_space<vmem>>, vector<8x128xf32>
    tpu.vector_store %arg5[%c16, %c0_21], %24 {strides = array<i32>} : memref<32x128xf32, #tpu.memory_space<vmem>>, vector<8x128xf32>,
    %c0_22 = arith.constant 0 : index
    %c0_23 = arith.constant 0 : index
    %26 = vector.load %arg5[%c0_22, %c0_23] : memref<32x128xf32, #tpu.memory_space<vmem>>, vector<32x128xf32>
    %c3 = arith.constant 3 : index
    %c0_24 = arith.constant 0 : index
    %c0_25 = arith.constant 0 : index
    %27 = vector.load %arg2[%c3, %c0_24, %c0_25] : memref<12x32x32xf32, #tpu.memory_space<vmem>>, vector<1x32x32xf32>
    %28 = vector.shape_cast %27 : vector<1x32x32xf32> to vector<32x32xf32>
    %c3_26 = arith.constant 3 : index
    %c0_27 = arith.constant 0 : index
    %c0_28 = arith.constant 0 : index
    %29 = vector.load %arg3[%c3_26, %c0_27, %c0_28] : memref<12x32x1xf32, #tpu.memory_space<vmem>>, vector<1x32x1xf32>
    %30 = vector.shape_cast %29 : vector<1x32x1xf32> to vector<32x1xf32>
    %cst_29 = arith.constant dense<0.000000e+00> : vector<32x128xf32>
    %31 = tpu.matmul %28, %26, %cst_29 {dimension_numbers = #tpu.dot_dimension_numbers<[1], [0], [0], [1], [0, 0, 1, 1], [], []>} : vector<32x32xf32>, vector<32x128xf32>, vector<32x128xf32> -> vector<32x128xf32>
    %32 = vector.broadcast %30 : vector<32x1xf32> to vector<32x128xf32>
    %33 = arith.addf %31, %32 : vector<32x128xf32>
    %34 = math.tanh %33 : vector<32x128xf32>
    %c4 = arith.constant 4 : index
    %c0_30 = arith.constant 0 : index
    %c0_31 = arith.constant 0 : index
    %35 = vector.load %arg2[%c4, %c0_30, %c0_31] : memref<12x32x32xf32, #tpu.memory_space<vmem>>, vector<1x32x32xf32>
    %36 = vector.shape_cast %35 : vector<1x32x32xf32> to vector<32x32xf32>
    %c4_32 = arith.constant 4 : index
    %c0_33 = arith.constant 0 : index
    %c0_34 = arith.constant 0 : index
    %37 = vector.load %arg3[%c4_32, %c0_33, %c0_34] : memref<12x32x1xf32, #tpu.memory_space<vmem>>, vector<1x32x1xf32>
    %38 = vector.shape_cast %37 : vector<1x32x1xf32> to vector<32x1xf32>
    %cst_35 = arith.constant dense<0.000000e+00> : vector<32x128xf32>
    %39 = tpu.matmul %36, %34, %cst_35 {dimension_numbers = #tpu.dot_dimension_numbers<[1], [0], [0], [1], [0, 0, 1, 1], [], []>} : vector<32x32xf32>, vector<32x128xf32>, vector<32x128xf32> -> vector<32x128xf32>
    %40 = vector.broadcast %38 : vector<32x1xf32> to vector<32x128xf32>
    %41 = arith.addf %39, %40 : vector<32x128xf32>
    %42 = math.tanh %41 : vector<32x128xf32>
    %c5 = arith.constant 5 : index
    %c0_36 = arith.constant 0 : index
    %c0_37 = arith.constant 0 : index
    %43 = vector.load %arg2[%c5, %c0_36, %c0_37] : memref<12x32x32xf32, #tpu.memory_space<vmem>>, vector<1x8x32xf32>
    %44 = vector.shape_cast %43 : vector<1x8x32xf32> to vector<8x32xf32>
    %c5_38 = arith.constant 5 : index
    %c0_39 = arith.constant 0 : index
    %c0_40 = arith.constant 0 : index
    %45 = vector.load %arg3[%c5_38, %c0_39, %c0_40] : memref<12x32x1xf32, #tpu.memory_space<vmem>>, vector<1x8x1xf32>
    %46 = vector.shape_cast %45 : vector<1x8x1xf32> to vector<8x1xf32>
    %cst_41 = arith.constant dense<0.000000e+00> : vector<8x128xf32>
    %47 = tpu.matmul %44, %42, %cst_41 {dimension_numbers = #tpu.dot_dimension_numbers<[1], [0], [0], [1], [0, 0, 1, 1], [], []>} : vector<8x32xf32>, vector<32x128xf32>, vector<8x128xf32> -> vector<8x128xf32>
    %48 = vector.broadcast %46 : vector<8x1xf32> to vector<8x128xf32>
    %49 = arith.addf %47, %48 : vector<8x128xf32>
    %50 = arith.addf %24, %49 : vector<8x128xf32>
    %c16_42 = arith.constant 16 : index
    %c0_43 = arith.constant 0 : index
    %51 = vector.load %arg5[%c16_42, %c0_43] : memref<32x128xf32, #tpu.memory_space<vmem>>, vector<8x128xf32>
    tpu.vector_store %arg5[%c16_42, %c0_43], %50 {strides = array<i32>} : memref<32x128xf32, #tpu.memory_space<vmem>>, vector<8x128xf32>,
    %c0_44 = arith.constant 0 : index
    %c0_45 = arith.constant 0 : index
    %52 = vector.load %arg5[%c0_44, %c0_45] : memref<32x128xf32, #tpu.memory_space<vmem>>, vector<32x128xf32>
    %c6 = arith.constant 6 : index
    %c0_46 = arith.constant 0 : index
    %c0_47 = arith.constant 0 : index
    %53 = vector.load %arg2[%c6, %c0_46, %c0_47] : memref<12x32x32xf32, #tpu.memory_space<vmem>>, vector<1x32x32xf32>
    %54 = vector.shape_cast %53 : vector<1x32x32xf32> to vector<32x32xf32>
    %c6_48 = arith.constant 6 : index
    %c0_49 = arith.constant 0 : index
    %c0_50 = arith.constant 0 : index
    %55 = vector.load %arg3[%c6_48, %c0_49, %c0_50] : memref<12x32x1xf32, #tpu.memory_space<vmem>>, vector<1x32x1xf32>
    %56 = vector.shape_cast %55 : vector<1x32x1xf32> to vector<32x1xf32>
    %cst_51 = arith.constant dense<0.000000e+00> : vector<32x128xf32>
    %57 = tpu.matmul %54, %52, %cst_51 {dimension_numbers = #tpu.dot_dimension_numbers<[1], [0], [0], [1], [0, 0, 1, 1], [], []>} : vector<32x32xf32>, vector<32x128xf32>, vector<32x128xf32> -> vector<32x128xf32>
    %58 = vector.broadcast %56 : vector<32x1xf32> to vector<32x128xf32>
    %59 = arith.addf %57, %58 : vector<32x128xf32>
    %60 = math.tanh %59 : vector<32x128xf32>
    %c7 = arith.constant 7 : index
    %c0_52 = arith.constant 0 : index
    %c0_53 = arith.constant 0 : index
    %61 = vector.load %arg2[%c7, %c0_52, %c0_53] : memref<12x32x32xf32, #tpu.memory_space<vmem>>, vector<1x32x32xf32>
    %62 = vector.shape_cast %61 : vector<1x32x32xf32> to vector<32x32xf32>
    %c7_54 = arith.constant 7 : index
    %c0_55 = arith.constant 0 : index
    %c0_56 = arith.constant 0 : index
    %63 = vector.load %arg3[%c7_54, %c0_55, %c0_56] : memref<12x32x1xf32, #tpu.memory_space<vmem>>, vector<1x32x1xf32>
    %64 = vector.shape_cast %63 : vector<1x32x1xf32> to vector<32x1xf32>
    %cst_57 = arith.constant dense<0.000000e+00> : vector<32x128xf32>
    %65 = tpu.matmul %62, %60, %cst_57 {dimension_numbers = #tpu.dot_dimension_numbers<[1], [0], [0], [1], [0, 0, 1, 1], [], []>} : vector<32x32xf32>, vector<32x128xf32>, vector<32x128xf32> -> vector<32x128xf32>
    %66 = vector.broadcast %64 : vector<32x1xf32> to vector<32x128xf32>
    %67 = arith.addf %65, %66 : vector<32x128xf32>
    %68 = math.tanh %67 : vector<32x128xf32>
    %c8 = arith.constant 8 : index
    %c0_58 = arith.constant 0 : index
    %c0_59 = arith.constant 0 : index
    %69 = vector.load %arg2[%c8, %c0_58, %c0_59] : memref<12x32x32xf32, #tpu.memory_space<vmem>>, vector<1x8x32xf32>
    %70 = vector.shape_cast %69 : vector<1x8x32xf32> to vector<8x32xf32>
    %c8_60 = arith.constant 8 : index
    %c0_61 = arith.constant 0 : index
    %c0_62 = arith.constant 0 : index
    %71 = vector.load %arg3[%c8_60, %c0_61, %c0_62] : memref<12x32x1xf32, #tpu.memory_space<vmem>>, vector<1x8x1xf32>
    %72 = vector.shape_cast %71 : vector<1x8x1xf32> to vector<8x1xf32>
    %cst_63 = arith.constant dense<0.000000e+00> : vector<8x128xf32>
    %73 = tpu.matmul %70, %68, %cst_63 {dimension_numbers = #tpu.dot_dimension_numbers<[1], [0], [0], [1], [0, 0, 1, 1], [], []>} : vector<8x32xf32>, vector<32x128xf32>, vector<8x128xf32> -> vector<8x128xf32>
    %74 = vector.broadcast %72 : vector<8x1xf32> to vector<8x128xf32>
    %75 = arith.addf %73, %74 : vector<8x128xf32>
    %76 = arith.addf %50, %75 : vector<8x128xf32>
    %c16_64 = arith.constant 16 : index
    %c0_65 = arith.constant 0 : index
    %77 = vector.load %arg5[%c16_64, %c0_65] : memref<32x128xf32, #tpu.memory_space<vmem>>, vector<8x128xf32>
    tpu.vector_store %arg5[%c16_64, %c0_65], %76 {strides = array<i32>} : memref<32x128xf32, #tpu.memory_space<vmem>>, vector<8x128xf32>,
    %c0_66 = arith.constant 0 : index
    %c0_67 = arith.constant 0 : index
    %78 = vector.load %arg5[%c0_66, %c0_67] : memref<32x128xf32, #tpu.memory_space<vmem>>, vector<32x128xf32>
    %c9 = arith.constant 9 : index
    %c0_68 = arith.constant 0 : index
    %c0_69 = arith.constant 0 : index
    %79 = vector.load %arg2[%c9, %c0_68, %c0_69] : memref<12x32x32xf32, #tpu.memory_space<vmem>>, vector<1x32x32xf32>
    %80 = vector.shape_cast %79 : vector<1x32x32xf32> to vector<32x32xf32>
    %c9_70 = arith.constant 9 : index
    %c0_71 = arith.constant 0 : index
    %c0_72 = arith.constant 0 : index
    %81 = vector.load %arg3[%c9_70, %c0_71, %c0_72] : memref<12x32x1xf32, #tpu.memory_space<vmem>>, vector<1x32x1xf32>
    %82 = vector.shape_cast %81 : vector<1x32x1xf32> to vector<32x1xf32>
    %cst_73 = arith.constant dense<0.000000e+00> : vector<32x128xf32>
    %83 = tpu.matmul %80, %78, %cst_73 {dimension_numbers = #tpu.dot_dimension_numbers<[1], [0], [0], [1], [0, 0, 1, 1], [], []>} : vector<32x32xf32>, vector<32x128xf32>, vector<32x128xf32> -> vector<32x128xf32>
    %84 = vector.broadcast %82 : vector<32x1xf32> to vector<32x128xf32>
    %85 = arith.addf %83, %84 : vector<32x128xf32>
    %86 = math.tanh %85 : vector<32x128xf32>
    %c10 = arith.constant 10 : index
    %c0_74 = arith.constant 0 : index
    %c0_75 = arith.constant 0 : index
    %87 = vector.load %arg2[%c10, %c0_74, %c0_75] : memref<12x32x32xf32, #tpu.memory_space<vmem>>, vector<1x32x32xf32>
    %88 = vector.shape_cast %87 : vector<1x32x32xf32> to vector<32x32xf32>
    %c10_76 = arith.constant 10 : index
    %c0_77 = arith.constant 0 : index
    %c0_78 = arith.constant 0 : index
    %89 = vector.load %arg3[%c10_76, %c0_77, %c0_78] : memref<12x32x1xf32, #tpu.memory_space<vmem>>, vector<1x32x1xf32>
    %90 = vector.shape_cast %89 : vector<1x32x1xf32> to vector<32x1xf32>
    %cst_79 = arith.constant dense<0.000000e+00> : vector<32x128xf32>
    %91 = tpu.matmul %88, %86, %cst_79 {dimension_numbers = #tpu.dot_dimension_numbers<[1], [0], [0], [1], [0, 0, 1, 1], [], []>} : vector<32x32xf32>, vector<32x128xf32>, vector<32x128xf32> -> vector<32x128xf32>
    %92 = vector.broadcast %90 : vector<32x1xf32> to vector<32x128xf32>
    %93 = arith.addf %91, %92 : vector<32x128xf32>
    %94 = math.tanh %93 : vector<32x128xf32>
    %c11 = arith.constant 11 : index
    %c0_80 = arith.constant 0 : index
    %c0_81 = arith.constant 0 : index
    %95 = vector.load %arg2[%c11, %c0_80, %c0_81] : memref<12x32x32xf32, #tpu.memory_space<vmem>>, vector<1x8x32xf32>
    %96 = vector.shape_cast %95 : vector<1x8x32xf32> to vector<8x32xf32>
    %c11_82 = arith.constant 11 : index
    %c0_83 = arith.constant 0 : index
    %c0_84 = arith.constant 0 : index
    %97 = vector.load %arg3[%c11_82, %c0_83, %c0_84] : memref<12x32x1xf32, #tpu.memory_space<vmem>>, vector<1x8x1xf32>
    %98 = vector.shape_cast %97 : vector<1x8x1xf32> to vector<8x1xf32>
    %cst_85 = arith.constant dense<0.000000e+00> : vector<8x128xf32>
    %99 = tpu.matmul %96, %94, %cst_85 {dimension_numbers = #tpu.dot_dimension_numbers<[1], [0], [0], [1], [0, 0, 1, 1], [], []>} : vector<8x32xf32>, vector<32x128xf32>, vector<8x128xf32> -> vector<8x128xf32>
    %100 = vector.broadcast %98 : vector<8x1xf32> to vector<8x128xf32>
    %101 = arith.addf %99, %100 : vector<8x128xf32>
    %102 = arith.addf %76, %101 : vector<8x128xf32>
    %c0_86 = arith.constant 0 : index
    %c0_87 = arith.constant 0 : index
    %103 = vector.load %arg4[%c0_86, %c0_87] : memref<8x128xf32, #tpu.memory_space<vmem>>, vector<8x128xf32>
    tpu.vector_store %arg4[%c0_86, %c0_87], %102 {strides = array<i32>} : memref<8x128xf32, #tpu.memory_space<vmem>>, vector<8x128xf32>,
    return
  }
  func.func @transform_0(%arg0: i32) -> (i32, i32) {
    %c0_i32 = arith.constant 0 : i32
    %c0_i32_0 = arith.constant 0 : i32
    return %c0_i32, %arg0 : i32, i32
  }
  func.func @transform_1(%arg0: i32) -> (i32, i32, i32) {
    %c0_i32 = arith.constant 0 : i32
    %c0_i32_0 = arith.constant 0 : i32
    %c0_i32_1 = arith.constant 0 : i32
    %c0_i32_2 = arith.constant 0 : i32
    return %c0_i32, %c0_i32_0, %c0_i32_1 : i32, i32, i32
  }
  func.func @transform_2(%arg0: i32) -> (i32, i32, i32) {
    %c0_i32 = arith.constant 0 : i32
    %c0_i32_0 = arith.constant 0 : i32
    %c0_i32_1 = arith.constant 0 : i32
    %c0_i32_2 = arith.constant 0 : i32
    return %c0_i32, %c0_i32_0, %c0_i32_1 : i32, i32, i32
  }
  func.func @transform_3(%arg0: i32) -> (i32, i32) {
    %c0_i32 = arith.constant 0 : i32
    %c0_i32_0 = arith.constant 0 : i32
    return %c0_i32, %arg0 : i32, i32
  }
}

</mosaic_0001>

<bundles_post_ra>
// kernel: tpu_custom_call.1
= control target key start
LH: loop header
LB: loop body
LE: loop exit
PB: predicated region body
PF: predicated region fallthrough
CT: control target
= control target key end

     0   :  { %8 = vsyncpa [#allocation4], 0  ;;  %s1346_s0 = inlined_call_operand.hbm [shape: f32[32,128], index: 0, kind: input, shape index: {}]   ;;  %s1347_s1 = inlined_call_operand.vmem [shape: f32[12,32,32], index: 1, kind: input, shape index: {}]   ;;  %s1348_s2 = inlined_call_operand.vmem [shape: f32[12,32,1], index: 2, kind: input, shape index: {}]   ;;  %s1349_s3 = inlined_call_operand.hbm [shape: f32[8,128], index: 3, kind: output, shape index: {}]  }
   0x1   :  { %9 = vsyncpa [#allocation5], 0  ;;  %s14_s14 = sshll.u32 %s1346_s0, 4  ;;  %s1030_s15 = smov [#allocation3]   ;;  %s15_s14 = int_to_ptr.hbm [resolvable:$true] %s14_s14 }
   0x2   :  { %s16_s16 = sshll.u32 %s1030_s15, 4  ;;  %s1031_s17 = smov 128   ;;  %s17_s16 = int_to_ptr.vmem [resolvable:$true] %s16_s16 }
   0x3   :  { %s1032_s18 = smov 8  }
   0x4   :  { %22 = dma.hbm_to_vmem [thread:$0]  %s15_s14, 512, %s17_s16, [#allocation4], %s1031_s17, %s1031_s17, %s1032_s18  }
   0x5   :  { %1026 = dma.done.wait [#allocation4], 512  }
   0x6   :  { %1027 = vsyncadd [#allocation4], 4294966784  ;;  %v1033_v0 = vmov 0   ;;  %v46_v1 = vld [vmem:[%s1348_s2 + $0x18] sm:$0xff]  ;;  %v44_v2 = vld [vmem:[%s1348_s2 + $0x8] sm:$0xff]  ;;  %vm67_vm0 = vcmask 261120  }
   0x7   :  { %912 = vset.pattern.permute.xlu1 %v1033_v0  ;;  %911 = vset.pattern.permute.xlu0 %v1033_v0  ;;  %v1064_v3 = vld [vmem:[#allocation3 + $0x18] sm:$0xff]  ;;  %v33_v4 = vld [vmem:[#allocation3 + $0x10] sm:$0xff]  ;;  %v1068_v5 = vld [vmem:[#allocation3 + $0x8] sm:$0xff]  ;;  %s1034_s21 = smov [#allocation6]   ;;  %s792_s23 = sshll.u32 %s1349_s3, 4  ;;  %s793_s23 = int_to_ptr.hbm [resolvable:$true] %s792_s23 }
   0x8   :  { %913 = vset.pattern.permute.xlu2 %v1033_v0  ;;  %64 = vperm.xlu0 %911, %v46_v1   ;;  %v1070_v6 = vld [vmem:[#allocation3] sm:$0xff]  ;;  %v45_v8 = vld [vmem:[%s1348_s2 + $0x10] sm:$0xff]  ;;  %v42_v10 = vld [vmem:[%s1347_s1 + $0x18] sm:$0xff]  ;;  %s790_s22 = sshll.u32 %s1034_s21, 4  ;;  %s791_s22 = int_to_ptr.vmem [resolvable:$true] %s790_s22 }
   0x9   :  { %54 = vperm.xlu1 %912, %v44_v2   ;;  %92 = vmatpush.msra.mxu0 %v1064_v3  ;;  %v39_v7 = vld [vmem:[%s1347_s1] sm:$0xff]  ;;  %v40_v11 = vld [vmem:[%s1347_s1 + $0x8] sm:$0xff]  ;;  %v41_v14 = vld [vmem:[%s1347_s1 + $0x10] sm:$0xff] }
   0xa   :  { %902 = vmatpush.msra.mxu3 %v1064_v3  ;;  %v43_v9 = vld [vmem:[%s1348_s2] sm:$0xff]  ;;  %v811_v12 = vld [vmem:[%s1348_s2 + $0x28] sm:$0xff]  ;;  %v828_v15 = vld [vmem:[%s1348_s2 + $0x78] sm:$0xff] }
   0xb   :  { %93 = vmatpush.msra.mxu0 %v33_v4  ;;  %v810_v13 = vld [vmem:[%s1348_s2 + $0x20] sm:$0xff]  ;;  %v827_v16 = vld [vmem:[%s1348_s2 + $0x70] sm:$0xff]  ;;  %v840_v18 = vld [vmem:[%s1348_s2 + $0x98] sm:$0xff] }
   0xc   :  { %903 = vmatpush.msra.mxu3 %v33_v4  ;;  %v825_v17 = vld [vmem:[%s1348_s2 + $0x60] sm:$0xff]  ;;  %v838_v19 = vld [vmem:[%s1348_s2 + $0x88] sm:$0xff]  ;;  %v855_v21 = vld [vmem:[%s1348_s2 + $0xd8] sm:$0xff] }
   0xd   :  { %94 = vmatpush.msra.mxu0 %v1068_v5  ;;  %v837_v20 = vld [vmem:[%s1348_s2 + $0x80] sm:$0xff]  ;;  %v854_v22 = vld [vmem:[%s1348_s2 + $0xd0] sm:$0xff]  ;;  %v867_v24 = vld [vmem:[%s1348_s2 + $0xf8] sm:$0xff] }
   0xe   :  { %904 = vmatpush.msra.mxu3 %v1068_v5  ;;  %v852_v23 = vld [vmem:[%s1348_s2 + $0xc0] sm:$0xff]  ;;  %v865_v25 = vld [vmem:[%s1348_s2 + $0xe8] sm:$0xff]  ;;  %v882_v27 = vld [vmem:[%s1348_s2 + $0x138] sm:$0xff] }
   0xf   :  { %95 = vmatpush.msra.mxu0 %v1070_v6  ;;  %v864_v26 = vld [vmem:[%s1348_s2 + $0xe0] sm:$0xff]  ;;  %v881_v28 = vld [vmem:[%s1348_s2 + $0x130] sm:$0xff]  ;;  %v894_v30 = vld [vmem:[%s1348_s2 + $0x158] sm:$0xff] }
  0x10   :  { %905 = vmatpush.msra.mxu3 %v1070_v6  ;;  %802 = vmatmul.msk.f32.vlgmr.msra.gmra.mxu0 %vm67_vm0, %v39_v7  ;;  %v879_v29 = vld [vmem:[%s1348_s2 + $0x120] sm:$0xff]  ;;  %v892_v31 = vld [vmem:[%s1348_s2 + $0x148] sm:$0xff]  ;;  %v813_v33 = vld [vmem:[%s1348_s2 + $0x38] sm:$0xff] }
  0x11   :  { %59 = vperm.xlu0 %911, %v45_v8   ;;  %49 = vperm.xlu1 %912, %v43_v9   ;;  %v891_v32 = vld [vmem:[%s1348_s2 + $0x140] sm:$0xff]  ;;  %v812_v34 = vld [vmem:[%s1348_s2 + $0x30] sm:$0xff]  ;;  %v826_v36 = vld [vmem:[%s1348_s2 + $0x68] sm:$0xff] }
  0x12   :  { %805 = vmatmul.msk.f32.vlgmr.msra.gmra.mxu3 %vm67_vm0, %v42_v10  ;;  %140 = vperm.xlu2 %913, %v813_v33   ;;  %v819_v35 = vld [vmem:[%s1348_s2 + $0x40] sm:$0xff]  ;;  %v839_v37 = vld [vmem:[%s1348_s2 + $0x90] sm:$0xff]  ;;  %v853_v45 = vld [vmem:[%s1348_s2 + $0xc8] sm:$0xff] }
  0x13   :  { %279 = vmatpush.msrb.mxu3 %v1064_v3  ;;  %v846_v39 = vld [vmem:[%s1348_s2 + $0xa0] sm:$0xff]  ;;  %v866_v51 = vld [vmem:[%s1348_s2 + $0xf0] sm:$0xff]  ;;  %v880_v59 = vld [vmem:[%s1348_s2 + $0x128] sm:$0xff] }
  0x14   :  { %v873_v55 = vld [vmem:[%s1348_s2 + $0x100] sm:$0xff]  ;;  %v807_v60 = vld [vmem:[%s1347_s1 + $0x28] sm:$0xff]  ;;  %v893_v61 = vld [vmem:[%s1348_s2 + $0x150] sm:$0xff] }
  0x15   :  { %v806_v57 = vld [vmem:[%s1347_s1 + $0x20] sm:$0xff]  ;;  %v808_v62 = vld [vmem:[%s1347_s1 + $0x30] sm:$0xff]  ;;  %v809_v0 = vld [vmem:[%s1347_s1 + $0x38] sm:$0xff] }
  0x16   :  { %v900_v63 = vld [vmem:[%s1348_s2 + $0x160] sm:$0xff] }
  0x18   :  { %803 = vmatmul.msk.f32.gmra.mxu0 %vm67_vm0, %v40_v11 }
  0x19   :  { %130 = vperm.xlu0 %911, %v811_v12   ;;  %125 = vperm.xlu1 %912, %v810_v13  }
  0x1a   :  { %135 = vperm.xlu2 %913, %v812_v34  }
  0x20   :  { %804 = vmatmul.msk.f32.gmra.mxu0 %vm67_vm0, %v41_v14 }
  0x21   :  { %252 = vperm.xlu0 %911, %v828_v15   ;;  %247 = vperm.xlu1 %912, %v827_v16  }
  0x22   :  { %194 = vperm.xlu2 %913, %v819_v35  }
  0x29   :  { %237 = vperm.xlu0 %911, %v825_v17   ;;  %327 = vperm.xlu1 %912, %v840_v18  }
  0x2a   :  { %242 = vperm.xlu2 %913, %v826_v36  }
  0x31   :  { %317 = vperm.xlu0 %911, %v838_v19   ;;  %312 = vperm.xlu1 %912, %v837_v20   ;;  %v818_v19 = vld [vmem:[%s1347_s1 + $0x40] sm:$0xff] }
  0x32   :  { %322 = vperm.xlu2 %913, %v839_v37  }
  0x39   :  { %440 = vperm.xlu0 %911, %v855_v21   ;;  %435 = vperm.xlu1 %912, %v854_v22  }
  0x3a   :  { %381 = vperm.xlu2 %913, %v846_v39  }
  0x41   :  { %425 = vperm.xlu0 %911, %v852_v23   ;;  %515 = vperm.xlu1 %912, %v867_v24   ;;  %v821_v24 = vld [vmem:[%s1347_s1 + $0x60] sm:$0xff] }
  0x42   :  { %430 = vperm.xlu2 %913, %v853_v45   ;;  %v834_v45 = vld [vmem:[%s1347_s1 + $0x88] sm:$0xff] }
  0x49   :  { %505 = vperm.xlu0 %911, %v865_v25   ;;  %500 = vperm.xlu1 %912, %v864_v26   ;;  %v822_v25 = vld [vmem:[%s1347_s1 + $0x68] sm:$0xff]  ;;  %v823_v26 = vld [vmem:[%s1347_s1 + $0x70] sm:$0xff] }
  0x4a   :  { %510 = vperm.xlu2 %913, %v866_v51  }
  0x51   :  { %628 = vperm.xlu0 %911, %v882_v27   ;;  %623 = vperm.xlu1 %912, %v881_v28   ;;  %v824_v27 = vld [vmem:[%s1347_s1 + $0x78] sm:$0xff] }
  0x52   :  { %569 = vperm.xlu2 %913, %v873_v55  }
  0x59   :  { %613 = vperm.xlu0 %911, %v879_v29   ;;  %703 = vperm.xlu1 %912, %v894_v30  }
  0x5a   :  { %618 = vperm.xlu2 %913, %v880_v59  }
  0x61   :  { %693 = vperm.xlu0 %911, %v892_v31   ;;  %688 = vperm.xlu1 %912, %v891_v32  }
  0x62   :  { %698 = vperm.xlu2 %913, %v893_v61  }
  0x6a   :  { %757 = vperm.xlu2 %913, %v900_v63  }
  0x6c   :  { %v141_v4 = vpop.permute.xlu2 %140 }
  0x74   :  { %v136_v8 = vpop.permute.xlu2 %135 }
  0x7a   :  { %v65_v40 = vpop.permute.xlu0 %64 }
  0x7b   :  { %v55_v42 = vpop.permute.xlu1 %54 }
  0x7c   :  { %v195_v21 = vpop.permute.xlu2 %194 }
  0x83   :  { %v60_v47 = vpop.permute.xlu0 %59  ;;  %v50_v52 = vpop.permute.xlu1 %49 }
  0x84   :  { %v243_v36 = vpop.permute.xlu2 %242 }
  0x8b   :  { %v131_v12 = vpop.permute.xlu0 %130  ;;  %v126_v14 = vpop.permute.xlu1 %125 }
  0x8c   :  { %v323_v51 = vpop.permute.xlu2 %322 }
  0x8d   :  { %v97_v38 = vpop.f32.mrf.mxu0 }
  0x8e   :  { %v98_v53 = vadd.f32 %v97_v38, %v50_v52 }
  0x93   :  { %v253_v31 = vpop.permute.xlu0 %252  ;;  %v248_v32 = vpop.permute.xlu1 %247 }
  0x95   :  { %v106_v41 = vpop.f32.mrf.mxu3  ;;  %v100_v43 = vpop.f32.mrf.mxu0 }
  0x96   :  { %v107_v44 = vadd.f32 %v106_v41, %v65_v40  ;;  %v101_v49 = vadd.f32 %v100_v43, %v55_v42  ;;  %v833_v43 = vld [vmem:[%s1347_s1 + $0x80] sm:$0xff] }
  0x98   :  { %914 = vtanh.f32 %v107_v44 }
  0x9b   :  { %v238_v38 = vpop.permute.xlu0 %237 }
  0x9d   :  { %v103_v48 = vpop.f32.mrf.mxu0 }
  0x9e   :  { %v915_v46 = vpop.eup %914  ;;  %v104_v50 = vadd.f32 %v103_v48, %v60_v47  ;;  %v836_v47 = vld [vmem:[%s1347_s1 + $0x98] sm:$0xff] }
  0x9f   :  { %167 = vmatpush.msra.mxu1 %v915_v46  ;;  %v835_v46 = vld [vmem:[%s1347_s1 + $0x90] sm:$0xff] }
  0xa0   :  { %916 = vtanh.f32 %v104_v50  ;;  %v328_v50 = vpop.permute.xlu1 %327 }
  0xa1   :  { %918 = vtanh.f32 %v101_v49 }
  0xa2   :  { %920 = vtanh.f32 %v98_v53 }
  0xa3   :  { %v318_v55 = vpop.permute.xlu0 %317 }
  0xa6   :  { %v917_v54 = vpop.eup %916 }
  0xa7   :  { %168 = vmatpush.msra.mxu1 %v917_v54  ;;  %v919_v56 = vpop.eup %918 }
  0xa8   :  { %v921_v58 = vpop.eup %920 }
  0xa9   :  { %169 = vmatpush.msra.mxu1 %v919_v56 }
  0xab   :  { %170 = vmatpush.msra.mxu1 %v921_v58 }
  0xac   :  { %814 = vmatmul.msk.f32.vlgmr.msra.gmra.mxu1 %vm67_vm0, %v806_v57  ;;  %v313_v57 = vpop.permute.xlu1 %312 }
  0xad   :  { %467 = vmatpush.msrb.mxu1 %v1064_v3 }
  0xb4   :  { %815 = vmatmul.msk.f32.gmra.mxu1 %vm67_vm0, %v807_v60 }
  0xbc   :  { %816 = vmatmul.msk.f32.gmra.mxu1 %vm67_vm0, %v808_v62  ;;  %v845_v62 = vld [vmem:[%s1347_s1 + $0xa0] sm:$0xff] }
  0xc4   :  { %817 = vmatmul.msk.f32.gmra.mxu1 %vm67_vm0, %v809_v0  ;;  %v382_v0 = vpop.permute.xlu2 %381 }
 0x129   :  { %v172_v1 = vpop.f32.mrf.mxu1 }
 0x12a   :  { %v173_v15 = vadd.f32 %v172_v1, %v126_v14  ;;  %v441_v14 = vpop.permute.xlu0 %440 }
 0x131   :  { %v175_v2 = vpop.f32.mrf.mxu1 }
 0x132   :  { %v176_v13 = vadd.f32 %v175_v2, %v131_v12 }
 0x139   :  { %v178_v7 = vpop.f32.mrf.mxu1 }
 0x13a   :  { %v179_v10 = vadd.f32 %v178_v7, %v136_v8  ;;  %v848_v7 = vld [vmem:[%s1347_s1 + $0xc0] sm:$0xff]  ;;  %v849_v8 = vld [vmem:[%s1347_s1 + $0xc8] sm:$0xff] }
 0x141   :  { %v181_v9 = vpop.f32.mrf.mxu1 }
 0x142   :  { %v182_v11 = vadd.f32 %v181_v9, %v141_v4  ;;  %v850_v9 = vld [vmem:[%s1347_s1 + $0xd0] sm:$0xff] }
 0x144   :  { %922 = vtanh.f32 %v182_v11 }
 0x145   :  { %924 = vtanh.f32 %v179_v10  ;;  %v851_v10 = vld [vmem:[%s1347_s1 + $0xd8] sm:$0xff] }
 0x146   :  { %926 = vtanh.f32 %v176_v13 }
 0x147   :  { %928 = vtanh.f32 %v173_v15  ;;  %v436_v15 = vpop.permute.xlu1 %435 }
 0x14a   :  { %v923_v16 = vpop.eup %922 }
 0x14b   :  { %212 = vmatpush.msra.mxu2 %v923_v16  ;;  %v925_v17 = vpop.eup %924 }
 0x14c   :  { %v927_v18 = vpop.eup %926 }
 0x14d   :  { %213 = vmatpush.msra.mxu2 %v925_v17  ;;  %v929_v20 = vpop.eup %928 }
 0x14f   :  { %214 = vmatpush.msra.mxu2 %v927_v18 }
 0x151   :  { %215 = vmatpush.msra.mxu2 %v929_v20 }
 0x152   :  { %820 = vmatmul.msk.f32.vlgmr.msra.gmra.mxu2 %vm67_vm0, %v818_v19  ;;  %v431_v19 = vpop.permute.xlu2 %430 }
 0x1d5   :  { %v217_v22 = vpop.f32.mrf.mxu2 }
 0x1d6   :  { %v1216_v23 = vadd.f32 %v217_v22, %v195_v21  ;;  %v426_v21 = vpop.permute.xlu0 %425 }
 0x1d8   :  { %280 = vmatpush.msrb.mxu3 %v1216_v23 }
 0x1da   :  { %281 = vmatpush.msrb.mxu3 %v1068_v5 }
 0x1dc   :  { %282 = vmatpush.msrb.mxu3 %v1070_v6 }
 0x1dd   :  { %829 = vmatmul.msk.f32.vlgmr.msrb.gmra.mxu3 %vm67_vm0, %v821_v24 }
 0x1e5   :  { %830 = vmatmul.msk.f32.gmra.mxu3 %vm67_vm0, %v822_v25 }
 0x1ed   :  { %831 = vmatmul.msk.f32.gmra.mxu3 %vm67_vm0, %v823_v26  ;;  %v860_v26 = vld [vmem:[%s1347_s1 + $0xe0] sm:$0xff] }
 0x1f5   :  { %832 = vmatmul.msk.f32.gmra.mxu3 %vm67_vm0, %v824_v27 }
 0x260   :  { %v284_v28 = vpop.f32.mrf.mxu3 }
 0x261   :  { %v285_v39 = vadd.f32 %v284_v28, %v238_v38  ;;  %v861_v28 = vld [vmem:[%s1347_s1 + $0xe8] sm:$0xff] }
 0x268   :  { %v287_v29 = vpop.f32.mrf.mxu3 }
 0x269   :  { %v288_v37 = vadd.f32 %v287_v29, %v243_v36  ;;  %v862_v29 = vld [vmem:[%s1347_s1 + $0xf0] sm:$0xff] }
 0x270   :  { %v290_v30 = vpop.f32.mrf.mxu3 }
 0x271   :  { %v291_v34 = vadd.f32 %v290_v30, %v248_v32  ;;  %v863_v30 = vld [vmem:[%s1347_s1 + $0xf8] sm:$0xff] }
 0x278   :  { %v293_v33 = vpop.f32.mrf.mxu3 }
 0x279   :  { %v294_v35 = vadd.f32 %v293_v33, %v253_v31 }
 0x27b   :  { %930 = vtanh.f32 %v294_v35  ;;  %v511_v35 = vpop.permute.xlu2 %510 }
 0x27c   :  { %932 = vtanh.f32 %v291_v34  ;;  %v516_v34 = vpop.permute.xlu1 %515 }
 0x27d   :  { %934 = vtanh.f32 %v288_v37 }
 0x27e   :  { %936 = vtanh.f32 %v285_v39  ;;  %v506_v39 = vpop.permute.xlu0 %505 }
 0x281   :  { %v931_v40 = vpop.eup %930 }
 0x282   :  { %354 = vmatpush.msrb.mxu2 %v931_v40  ;;  %v933_v41 = vpop.eup %932 }
 0x283   :  { %v935_v42 = vpop.eup %934 }
 0x284   :  { %355 = vmatpush.msrb.mxu2 %v933_v41  ;;  %v937_v44 = vpop.eup %936  ;;  %v501_v41 = vpop.permute.xlu1 %500 }
 0x286   :  { %356 = vmatpush.msrb.mxu2 %v935_v42 }
 0x288   :  { %357 = vmatpush.msrb.mxu2 %v937_v44 }
 0x289   :  { %841 = vmatmul.msk.f32.vlgmr.msrb.gmra.mxu2 %vm67_vm0, %v833_v43 }
 0x28a   :  { %655 = vmatpush.msra.mxu2 %v1064_v3 }
 0x291   :  { %842 = vmatmul.msk.f32.gmra.mxu2 %vm67_vm0, %v834_v45 }
 0x299   :  { %843 = vmatmul.msk.f32.gmra.mxu2 %vm67_vm0, %v835_v46  ;;  %v872_v46 = vld [vmem:[%s1347_s1 + $0x100] sm:$0xff] }
 0x2a1   :  { %844 = vmatmul.msk.f32.gmra.mxu2 %vm67_vm0, %v836_v47 }
 0x30c   :  { %v359_v48 = vpop.f32.mrf.mxu2 }
 0x30d   :  { %v360_v58 = vadd.f32 %v359_v48, %v313_v57  ;;  %v570_v48 = vpop.permute.xlu2 %569  ;;  %v624_v57 = vpop.permute.xlu1 %623 }
 0x314   :  { %v362_v3 = vpop.f32.mrf.mxu2 }
 0x315   :  { %v363_v56 = vadd.f32 %v362_v3, %v318_v55 }
 0x31c   :  { %v365_v49 = vpop.f32.mrf.mxu2 }
 0x31d   :  { %v366_v53 = vadd.f32 %v365_v49, %v323_v51  ;;  %v875_v51 = vld [vmem:[%s1347_s1 + $0x120] sm:$0xff] }
 0x324   :  { %v368_v52 = vpop.f32.mrf.mxu2 }
 0x325   :  { %v369_v54 = vadd.f32 %v368_v52, %v328_v50  ;;  %v876_v52 = vld [vmem:[%s1347_s1 + $0x128] sm:$0xff] }
 0x327   :  { %938 = vtanh.f32 %v369_v54 }
 0x328   :  { %940 = vtanh.f32 %v366_v53  ;;  %v877_v53 = vld [vmem:[%s1347_s1 + $0x130] sm:$0xff] }
 0x329   :  { %942 = vtanh.f32 %v363_v56  ;;  %v629_v56 = vpop.permute.xlu0 %628 }
 0x32a   :  { %944 = vtanh.f32 %v360_v58 }
 0x32d   :  { %v939_v59 = vpop.eup %938 }
 0x32e   :  { %399 = vmatpush.msrb.mxu0 %v939_v59  ;;  %v941_v60 = vpop.eup %940 }
 0x32f   :  { %v943_v61 = vpop.eup %942 }
 0x330   :  { %400 = vmatpush.msrb.mxu0 %v941_v60  ;;  %v945_v63 = vpop.eup %944 }
 0x332   :  { %401 = vmatpush.msrb.mxu0 %v943_v61  ;;  %v619_v61 = vpop.permute.xlu2 %618 }
 0x334   :  { %402 = vmatpush.msrb.mxu0 %v945_v63  ;;  %v614_v63 = vpop.permute.xlu0 %613 }
 0x335   :  { %847 = vmatmul.msk.f32.vlgmr.msrb.gmra.mxu0 %vm67_vm0, %v845_v62 }
 0x3b2   :  { %v404_v1 = vpop.f32.mrf.mxu0 }
 0x3b3   :  { %v405_v2 = vadd.f32 %v404_v1, %v382_v0 }
 0x3b5   :  { %v1259_v4 = vadd.f32 %v405_v2, %v1216_v23 }
 0x3b7   :  { %468 = vmatpush.msrb.mxu1 %v1259_v4 }
 0x3b9   :  { %469 = vmatpush.msrb.mxu1 %v1068_v5 }
 0x3bb   :  { %470 = vmatpush.msrb.mxu1 %v1070_v6 }
 0x3bc   :  { %856 = vmatmul.msk.f32.vlgmr.msrb.gmra.mxu1 %vm67_vm0, %v848_v7  ;;  %v887_v7 = vld [vmem:[%s1347_s1 + $0x140] sm:$0xff] }
 0x3c4   :  { %857 = vmatmul.msk.f32.gmra.mxu1 %vm67_vm0, %v849_v8 }
 0x3cc   :  { %858 = vmatmul.msk.f32.gmra.mxu1 %vm67_vm0, %v850_v9  ;;  %v888_v9 = vld [vmem:[%s1347_s1 + $0x148] sm:$0xff] }
 0x3d4   :  { %859 = vmatmul.msk.f32.gmra.mxu1 %vm67_vm0, %v851_v10  ;;  %v889_v10 = vld [vmem:[%s1347_s1 + $0x150] sm:$0xff] }
 0x439   :  { %v472_v11 = vpop.f32.mrf.mxu1 }
 0x43a   :  { %v473_v22 = vadd.f32 %v472_v11, %v426_v21  ;;  %v890_v11 = vld [vmem:[%s1347_s1 + $0x158] sm:$0xff] }
 0x441   :  { %v475_v12 = vpop.f32.mrf.mxu1 }
 0x442   :  { %v476_v20 = vadd.f32 %v475_v12, %v431_v19 }
 0x449   :  { %v478_v13 = vpop.f32.mrf.mxu1 }
 0x44a   :  { %v479_v17 = vadd.f32 %v478_v13, %v436_v15  ;;  %v704_v15 = vpop.permute.xlu1 %703 }
 0x451   :  { %v481_v16 = vpop.f32.mrf.mxu1 }
 0x452   :  { %v482_v18 = vadd.f32 %v481_v16, %v441_v14  ;;  %v699_v16 = vpop.permute.xlu2 %698 }
 0x454   :  { %946 = vtanh.f32 %v482_v18 }
 0x455   :  { %948 = vtanh.f32 %v479_v17 }
 0x456   :  { %950 = vtanh.f32 %v476_v20  ;;  %v694_v20 = vpop.permute.xlu0 %693 }
 0x457   :  { %952 = vtanh.f32 %v473_v22  ;;  %v689_v22 = vpop.permute.xlu1 %688 }
 0x45a   :  { %v947_v23 = vpop.eup %946 }
 0x45b   :  { %542 = vmatpush.msra.mxu3 %v947_v23  ;;  %v949_v24 = vpop.eup %948 }
 0x45c   :  { %v951_v25 = vpop.eup %950 }
 0x45d   :  { %543 = vmatpush.msra.mxu3 %v949_v24  ;;  %v953_v27 = vpop.eup %952 }
 0x45f   :  { %544 = vmatpush.msra.mxu3 %v951_v25 }
 0x461   :  { %545 = vmatpush.msra.mxu3 %v953_v27  ;;  %v899_v27 = vld [vmem:[%s1347_s1 + $0x160] sm:$0xff] }
 0x462   :  { %868 = vmatmul.msk.f32.vlgmr.msra.gmra.mxu3 %vm67_vm0, %v860_v26 }
 0x46a   :  { %869 = vmatmul.msk.f32.gmra.mxu3 %vm67_vm0, %v861_v28 }
 0x472   :  { %870 = vmatmul.msk.f32.gmra.mxu3 %vm67_vm0, %v862_v29  ;;  %v758_v29 = vpop.permute.xlu2 %757 }
 0x47a   :  { %871 = vmatmul.msk.f32.gmra.mxu3 %vm67_vm0, %v863_v30 }
 0x4e5   :  { %v547_v31 = vpop.f32.mrf.mxu3 }
 0x4e6   :  { %v548_v42 = vadd.f32 %v547_v31, %v501_v41 }
 0x4ed   :  { %v550_v32 = vpop.f32.mrf.mxu3 }
 0x4ee   :  { %v551_v40 = vadd.f32 %v550_v32, %v506_v39 }
 0x4f5   :  { %v553_v33 = vpop.f32.mrf.mxu3 }
 0x4f6   :  { %v554_v37 = vadd.f32 %v553_v33, %v511_v35 }
 0x4fd   :  { %v556_v36 = vpop.f32.mrf.mxu3 }
 0x4fe   :  { %v557_v38 = vadd.f32 %v556_v36, %v516_v34 }
 0x500   :  { %954 = vtanh.f32 %v557_v38 }
 0x501   :  { %956 = vtanh.f32 %v554_v37 }
 0x502   :  { %958 = vtanh.f32 %v551_v40 }
 0x503   :  { %960 = vtanh.f32 %v548_v42 }
 0x506   :  { %v955_v43 = vpop.eup %954 }
 0x507   :  { %587 = vmatpush.msra.mxu0 %v955_v43  ;;  %v957_v44 = vpop.eup %956 }
 0x508   :  { %v959_v45 = vpop.eup %958 }
 0x509   :  { %588 = vmatpush.msra.mxu0 %v957_v44  ;;  %v961_v47 = vpop.eup %960 }
 0x50b   :  { %589 = vmatpush.msra.mxu0 %v959_v45 }
 0x50d   :  { %590 = vmatpush.msra.mxu0 %v961_v47 }
 0x50e   :  { %874 = vmatmul.msk.f32.vlgmr.msra.gmra.mxu0 %vm67_vm0, %v872_v46 }
 0x58b   :  { %v592_v3 = vpop.f32.mrf.mxu0 }
 0x58c   :  { %v593_v49 = vadd.f32 %v592_v3, %v570_v48 }
 0x58e   :  { %v1301_v50 = vadd.f32 %v593_v49, %v1259_v4 }
 0x590   :  { %656 = vmatpush.msra.mxu2 %v1301_v50 }
 0x592   :  { %657 = vmatpush.msra.mxu2 %v1068_v5  ;;  %v878_v5 = vld [vmem:[%s1347_s1 + $0x138] sm:$0xff] }
 0x594   :  { %658 = vmatpush.msra.mxu2 %v1070_v6 }
 0x595   :  { %883 = vmatmul.msk.f32.vlgmr.msra.gmra.mxu2 %vm67_vm0, %v875_v51 }
 0x59d   :  { %884 = vmatmul.msk.f32.gmra.mxu2 %vm67_vm0, %v876_v52 }
 0x5a5   :  { %885 = vmatmul.msk.f32.gmra.mxu2 %vm67_vm0, %v877_v53 }
 0x5ad   :  { %886 = vmatmul.msk.f32.gmra.mxu2 %vm67_vm0, %v878_v5 }
 0x618   :  { %v660_v6 = vpop.f32.mrf.mxu2 }
 0x619   :  { %v661_v0 = vadd.f32 %v660_v6, %v614_v63 }
 0x620   :  { %v663_v54 = vpop.f32.mrf.mxu2 }
 0x621   :  { %v664_v62 = vadd.f32 %v663_v54, %v619_v61 }
 0x628   :  { %v666_v55 = vpop.f32.mrf.mxu2 }
 0x629   :  { %v667_v59 = vadd.f32 %v666_v55, %v624_v57 }
 0x630   :  { %v669_v58 = vpop.f32.mrf.mxu2 }
 0x631   :  { %v670_v60 = vadd.f32 %v669_v58, %v629_v56 }
 0x633   :  { %962 = vtanh.f32 %v670_v60 }
 0x634   :  { %964 = vtanh.f32 %v667_v59 }
 0x635   :  { %966 = vtanh.f32 %v664_v62 }
 0x636   :  { %968 = vtanh.f32 %v661_v0 }
 0x639   :  { %v963_v1 = vpop.eup %962 }
 0x63a   :  { %730 = vmatpush.msrb.mxu0 %v963_v1  ;;  %v965_v2 = vpop.eup %964 }
 0x63b   :  { %v967_v4 = vpop.eup %966 }
 0x63c   :  { %731 = vmatpush.msrb.mxu0 %v965_v2  ;;  %v969_v8 = vpop.eup %968 }
 0x63e   :  { %732 = vmatpush.msrb.mxu0 %v967_v4 }
 0x640   :  { %733 = vmatpush.msrb.mxu0 %v969_v8 }
 0x641   :  { %895 = vmatmul.msk.f32.vlgmr.msrb.gmra.mxu0 %vm67_vm0, %v887_v7 }
 0x649   :  { %896 = vmatmul.msk.f32.gmra.mxu0 %vm67_vm0, %v888_v9 }
 0x651   :  { %897 = vmatmul.msk.f32.gmra.mxu0 %vm67_vm0, %v889_v10 }
 0x659   :  { %898 = vmatmul.msk.f32.gmra.mxu0 %vm67_vm0, %v890_v11 }
 0x6be   :  { %v735_v12 = vpop.f32.mrf.mxu0 }
 0x6bf   :  { %v736_v23 = vadd.f32 %v735_v12, %v689_v22 }
 0x6c6   :  { %v738_v13 = vpop.f32.mrf.mxu0 }
 0x6c7   :  { %v739_v21 = vadd.f32 %v738_v13, %v694_v20 }
 0x6ce   :  { %v741_v14 = vpop.f32.mrf.mxu0 }
 0x6cf   :  { %v742_v18 = vadd.f32 %v741_v14, %v699_v16 }
 0x6d6   :  { %v744_v17 = vpop.f32.mrf.mxu0 }
 0x6d7   :  { %v745_v19 = vadd.f32 %v744_v17, %v704_v15 }
 0x6d9   :  { %970 = vtanh.f32 %v745_v19 }
 0x6da   :  { %972 = vtanh.f32 %v742_v18 }
 0x6db   :  { %974 = vtanh.f32 %v739_v21 }
 0x6dc   :  { %976 = vtanh.f32 %v736_v23 }
 0x6df   :  { %v971_v24 = vpop.eup %970 }
 0x6e0   :  { %775 = vmatpush.msra.mxu1 %v971_v24  ;;  %v973_v25 = vpop.eup %972 }
 0x6e1   :  { %v975_v26 = vpop.eup %974 }
 0x6e2   :  { %776 = vmatpush.msra.mxu1 %v973_v25  ;;  %v977_v28 = vpop.eup %976 }
 0x6e4   :  { %777 = vmatpush.msra.mxu1 %v975_v26 }
 0x6e6   :  { %778 = vmatpush.msra.mxu1 %v977_v28 }
 0x6e7   :  { %901 = vmatmul.msk.f32.vlgmr.msra.gmra.mxu1 %vm67_vm0, %v899_v27 }
 0x764   :  { %v780_v30 = vpop.f32.mrf.mxu1 }
 0x765   :  { %v781_v31 = vadd.f32 %v780_v30, %v758_v29 }
 0x767   :  { %v783_v32 = vadd.f32 %v781_v31, %v1301_v50 }
 0x769   :  { %784 = vst [vmem:[#allocation6] sm:$0xff] %v783_v32 }
 0x76a   :  { %795 = dma.vmem_to_hbm [thread:$0]  %s791_s22, 128, %s793_s23, [#allocation5]  }
 0x76b   :  { %1028 = dma.done.wait [#allocation5], 128  }
 0x76c   :  { %1029 = vsyncadd [#allocation5], 4294967168 }
 0x76d   :  { %800 = vsyncpa [#allocation4], 1 }
 0x76e   :  { %801 = vsyncpa [#allocation5], 1 }

</bundles_post_ra>
